<compile_context>
chip_gen: v7x
topology: tpu7x:2x2x1
jax: 0.10.0
libtpu: 0.0.40
codegen_flags: <defaults>
</compile_context>

<pallas_src>
import functools

import jax
import jax.numpy as jnp
from jax.experimental import pallas as pl
from jax.experimental.pallas import tpu as pltpu

LANE = 128      # vreg lane width
SUB_ROWS = 512  # rows per inner fori_loop slice (bounds vreg live ranges)


def _sublane_multiple(dtype) -> int:
    """Rows per native vreg tile for this dtype (f32:8, bf16:16, int8/fp8:32)."""
    return max(8, 32 // max(1, jnp.dtype(dtype).itemsize))


def _tpu_config():
    """Per-generation (block_rows_cap, max_row_chunks, vmem_limit_bytes)."""
    kind = ""
    try:
        kind = jax.devices()[0].device_kind.lower()
    except Exception:
        pass
    if "v7" in kind or "7x" in kind:
        # 64 MiB VMEM/TC: 2 inputs x 2 buffers x 8 MiB = 32 MiB, + headroom.
        # 2 TensorCores -> feed both via the "parallel" chunk axis.
        return 16384, 2, 48 << 20
    if "v6" in kind:
        # 32 MiB scoped-VMEM default: 2 x 2 x 4 MiB = 16 MiB fits; 1 TC.
        return 8192, 1, None
    # v5e (16 MiB scoped-VMEM default) and unknown generations: conservative.
    return 4096, 1, None


def _kl_loss_kernel(pred_ref, tgt_ref, psum_ref, *, total_groups, nb, k_steps,
                    block_groups, sub_groups, row_align, has_clamped,
                    has_partial):
    """Accumulate sum((log(target) - output)^2) for one (bg, row_align, 128) block."""
    p = pl.program_id(0)
    k = pl.program_id(1)
    blk = p * k_steps + k

    @pl.when(k == 0)
    def _():
        psum_ref[...] = jnp.zeros_like(psum_ref)

    def _partial_sum(t_blk, o_blk, g_offset, mask_groups):
        d = jnp.log(t_blk.astype(jnp.float32)) - o_blk.astype(jnp.float32)
        s = d * d
        if mask_groups:
            # Only the single partial last block takes this path; mask AFTER
            # squaring so OOB garbage/NaN cannot leak into the sum.
            g_ids = jax.lax.broadcasted_iota(jnp.int32, s.shape, 0) + g_offset
            s = jnp.where(g_ids < total_groups, s, jnp.float32(0.0))
        # Reduce over the leading (untiled) axis: pure vreg-wise VPU adds.
        return jnp.sum(s, axis=0)

    def _accumulate(mask_groups):
        n_iter = block_groups // sub_groups
        blk_g0 = blk * block_groups
        if n_iter == 1:
            acc = _partial_sum(tgt_ref[...], pred_ref[...], blk_g0, mask_groups)
        else:
            def body(i, acc):
                g0 = pl.multiple_of(i * sub_groups, sub_groups)
                return acc + _partial_sum(tgt_ref[pl.ds(g0, sub_groups)],
                                          pred_ref[pl.ds(g0, sub_groups)],
                                          blk_g0 + g0, mask_groups)
            acc = jax.lax.fori_loop(0, n_iter, body,
                                    jnp.zeros((row_align, LANE), jnp.float32))
        # Full unmasked (row_align,128) vreg accumulate into the resident block.
        psum_ref[...] += acc

    # Fast path: a full, in-range block pays zero masking cost.
    fast_cond = None
    if has_clamped:
        fast_cond = blk < nb
    if has_partial:
        c = blk != (nb - 1)
        fast_cond = c if fast_cond is None else jnp.logical_and(fast_cond, c)

    if fast_cond is None:
        _accumulate(mask_groups=False)
    else:
        @pl.when(fast_cond)
        def _():
            _accumulate(mask_groups=False)

    if has_partial:
        @pl.when(blk == nb - 1)
        def _():
            _accumulate(mask_groups=True)


def _kl_loss_pallas(pred3d, tgt3d, *, cap_rows, max_chunks, vmem_limit):
    """Sum of (log(tgt)-pred)^2 over a (groups, row_align, 128) slab -> scalar f32."""
    total_groups, row_align, _ = pred3d.shape
    rows = total_groups * row_align

    block_rows = min(cap_rows, rows)            # both multiples of row_align
    block_groups = block_rows // row_align
    nb = pl.cdiv(total_groups, block_groups)    # total blocks
    p_chunks = max_chunks if (max_chunks > 1 and nb >= max_chunks) else 1
    k_steps = pl.cdiv(nb, p_chunks)             # sequential blocks per chunk
    has_clamped = (p_chunks * k_steps) != nb    # superfluous trailing step(s)
    has_partial = (nb * block_groups) != total_groups

    # Inner-loop slice: largest divisor of block_groups covering <=SUB_ROWS rows.
    sub_groups = min(block_groups, max(1, SUB_ROWS // row_align))
    while block_groups % sub_groups:
        sub_groups -= 1

    if has_clamped:
        def in_index_map(p, k):
            # Clamp so superfluous steps re-read a valid block; their
            # contribution is skipped entirely inside the kernel.
            return (jnp.minimum(p * k_steps + k, nb - 1), 0, 0)
    else:
        def in_index_map(p, k):
            return (p * k_steps + k, 0, 0)

    kernel = functools.partial(
        _kl_loss_kernel, total_groups=total_groups, nb=nb, k_steps=k_steps,
        block_groups=block_groups, sub_groups=sub_groups, row_align=row_align,
        has_clamped=has_clamped, has_partial=has_partial)

    cp_kwargs = dict(dimension_semantics=("parallel", "arbitrary"))
    if vmem_limit is not None:
        cp_kwargs["vmem_limit_bytes"] = vmem_limit

    n_main = rows * LANE
    bytes_in = n_main * (pred3d.dtype.itemsize + tgt3d.dtype.itemsize)

    partials = pl.pallas_call(
        kernel,
        out_shape=jax.ShapeDtypeStruct((p_chunks * row_align, LANE), jnp.float32),
        grid_spec=pltpu.PrefetchScalarGridSpec(
            num_scalar_prefetch=0,
            grid=(p_chunks, k_steps),
            in_specs=[
                pl.BlockSpec((block_groups, row_align, LANE), in_index_map),
                pl.BlockSpec((block_groups, row_align, LANE), in_index_map),
            ],
            out_specs=pl.BlockSpec((row_align, LANE), lambda p, k: (p, 0)),
        ),
        compiler_params=pltpu.CompilerParams(**cp_kwargs),
        cost_estimate=pl.CostEstimate(
            flops=3 * n_main,
            transcendentals=n_main,
            bytes_accessed=bytes_in + p_chunks * row_align * LANE * 4,
        ),
    )(pred3d, tgt3d)

    # Final cross-lane / cross-sublane / cross-chunk fold (tiny) in plain XLA.
    return jnp.sum(partials)


@jax.jit
def kl_loss(output: jax.Array, target: jax.Array) -> jax.Array:
    """Pallas implementation of KLLoss.forward(output, target) -> scalar f32."""
    assert output.shape == target.shape, "output/target must have the same shape"

    n = output.size
    pred_flat = output.reshape(-1)
    tgt_flat = target.reshape(-1)

    row_align = max(_sublane_multiple(output.dtype),
                    _sublane_multiple(target.dtype))
    cap_rows, max_chunks, vmem_limit = _tpu_config()

    group_elems = row_align * LANE
    total_groups = n // group_elems
    n_main = total_groups * group_elems

    total = jnp.zeros((), jnp.float32)
    if total_groups > 0:
        # Aligned prefix: layout-preserving reshape only (no pad / copy in the
        # common aligned case).
        pred_main = pred_flat if n_main == n else pred_flat[:n_main]
        tgt_main = tgt_flat if n_main == n else tgt_flat[:n_main]
        pred3d = pred_main.reshape(total_groups, row_align, LANE)
        tgt3d = tgt_main.reshape(total_groups, row_align, LANE)
        total = total + _kl_loss_pallas(pred3d, tgt3d, cap_rows=cap_rows,
                                        max_chunks=max_chunks,
                                        vmem_limit=vmem_limit)
    if n_main < n:
        # < row_align*128 leftover elements: fold in with a tiny XLA expression
        # instead of paying a full-array jnp.pad copy.
        t_tail = tgt_flat[n_main:].astype(jnp.float32)
        o_tail = pred_flat[n_main:].astype(jnp.float32)
        total = total + jnp.sum(jnp.square(jnp.log(t_tail) - o_tail))
    return total


def kl_loss_ref(output, target):
    """Pure-JAX reference matching the PyTorch module."""
    return jnp.mean(jnp.sum(jnp.square(jnp.log(target) - output)))


if __name__ == "__main__":
    key = jax.random.PRNGKey(0)
    k1, k2 = jax.random.split(key)

    shape = (2, 4, 16, 16)
    output = jax.random.normal(k1, shape, dtype=jnp.float32)
    # target goes through log -> keep it strictly positive (prob-like input).
    target = jax.random.uniform(k2, shape, dtype=jnp.float32,
                                minval=0.05, maxval=1.0)

    got = jax.block_until_ready(kl_loss(output, target))
    want = jax.block_until_ready(kl_loss_ref(output, target))

    assert jnp.allclose(got, want, rtol=1e-4, atol=1e-4), (got, want)
    print("KERNEL_OK")
</pallas_src>

<mosaic_0001>
module attributes {stable_mosaic.version = 11 : i64} {
  func.func @_kl_loss_kernel(%arg0: i32, %arg1: i32, %arg2: memref<2x8x128xf32, #tpu.memory_space<vmem>>, %arg3: memref<2x8x128xf32, #tpu.memory_space<vmem>>, %arg4: memref<8x128xf32, #tpu.memory_space<vmem>>) attributes {dimension_semantics = [#tpu.dimension_semantics<parallel>, #tpu.dimension_semantics<arbitrary>], iteration_bounds = array<i64: 1, 1>, scalar_prefetch = 0 : i64, scratch_operands = 0 : i64, tpu.core_type = #tpu.core_type<tc>, window_params = [{transform_indices = @transform_0, window_bounds = array<i64: 2, 8, 128>}, {transform_indices = @transform_1, window_bounds = array<i64: 2, 8, 128>}, {transform_indices = @transform_2, window_bounds = array<i64: 8, 128>}]} {
    %c0_i32 = arith.constant 0 : i32
    %0 = arith.cmpi eq, %arg1, %c0_i32 : i32
    %1 = arith.extui %0 : i1 to i32
    %c0_i32_0 = arith.constant 0 : i32
    %2 = arith.cmpi ne, %1, %c0_i32_0 : i32
    scf.if %2 {
      %cst_10 = arith.constant 0.000000e+00 : f32
      %12 = vector.broadcast %cst_10 : f32 to vector<8x128xf32>
      %c0_11 = arith.constant 0 : index
      %c0_12 = arith.constant 0 : index
      %13 = vector.load %arg4[%c0_11, %c0_12] : memref<8x128xf32, #tpu.memory_space<vmem>>, vector<8x128xf32>
      tpu.vector_store %arg4[%c0_11, %c0_12], %12 {strides = array<i32>} : memref<8x128xf32, #tpu.memory_space<vmem>>, vector<8x128xf32>,
    } else {
    }
    %c0 = arith.constant 0 : index
    %c0_1 = arith.constant 0 : index
    %c0_2 = arith.constant 0 : index
    %3 = vector.load %arg3[%c0, %c0_1, %c0_2] : memref<2x8x128xf32, #tpu.memory_space<vmem>>, vector<2x8x128xf32>
    %c0_3 = arith.constant 0 : index
    %c0_4 = arith.constant 0 : index
    %c0_5 = arith.constant 0 : index
    %4 = vector.load %arg2[%c0_3, %c0_4, %c0_5] : memref<2x8x128xf32, #tpu.memory_space<vmem>>, vector<2x8x128xf32>
    %5 = math.log %3 : vector<2x8x128xf32>
    %6 = arith.subf %5, %4 : vector<2x8x128xf32>
    %7 = arith.mulf %6, %6 : vector<2x8x128xf32>
    %cst = arith.constant dense<0.000000e+00> : vector<8x128xf32>
    %8 = vector.multi_reduction <add>, %7, %cst [0] : vector<2x8x128xf32> to vector<8x128xf32>
    %c0_6 = arith.constant 0 : index
    %c0_7 = arith.constant 0 : index
    %9 = vector.load %arg4[%c0_6, %c0_7] : memref<8x128xf32, #tpu.memory_space<vmem>>, vector<8x128xf32>
    %10 = arith.addf %9, %8 : vector<8x128xf32>
    %c0_8 = arith.constant 0 : index
    %c0_9 = arith.constant 0 : index
    %11 = vector.load %arg4[%c0_8, %c0_9] : memref<8x128xf32, #tpu.memory_space<vmem>>, vector<8x128xf32>
    tpu.vector_store %arg4[%c0_8, %c0_9], %10 {strides = array<i32>} : memref<8x128xf32, #tpu.memory_space<vmem>>, vector<8x128xf32>,
    return
  }
  func.func @transform_0(%arg0: i32, %arg1: i32) -> (i32, i32, i32) {
    %c1_i32 = arith.constant 1 : i32
    %0 = arith.muli %arg0, %c1_i32 : i32
    %1 = arith.addi %0, %arg1 : i32
    %c0_i32 = arith.constant 0 : i32
    %c0_i32_0 = arith.constant 0 : i32
    %c0_i32_1 = arith.constant 0 : i32
    return %1, %c0_i32, %c0_i32_0 : i32, i32, i32
  }
  func.func @transform_1(%arg0: i32, %arg1: i32) -> (i32, i32, i32) {
    %c1_i32 = arith.constant 1 : i32
    %0 = arith.muli %arg0, %c1_i32 : i32
    %1 = arith.addi %0, %arg1 : i32
    %c0_i32 = arith.constant 0 : i32
    %c0_i32_0 = arith.constant 0 : i32
    %c0_i32_1 = arith.constant 0 : i32
    return %1, %c0_i32, %c0_i32_0 : i32, i32, i32
  }
  func.func @transform_2(%arg0: i32, %arg1: i32) -> (i32, i32) {
    %c0_i32 = arith.constant 0 : i32
    %c0_i32_0 = arith.constant 0 : i32
    return %arg0, %c0_i32 : i32, i32
  }
}

</mosaic_0001>

<bundles_post_ra>
// kernel: kl_loss.1
= control target key start
LH: loop header
LB: loop body
LE: loop exit
PB: predicated region body
PF: predicated region fallthrough
CT: control target
= control target key end

     0   :  { %s127_s1 = inlined_call_operand.vmem [shape: f32[2,8,128], index: 1, kind: input, shape index: {}]   ;;  %s128_s0 = inlined_call_operand.vmem [shape: f32[2,8,128], index: 0, kind: input, shape index: {}]   ;;  %s129_s2 = inlined_call_operand.vmem [shape: f32[8,128], index: 2, kind: output, shape index: {}]  }
   0x1   :  { %v60_v0 = vld [vmem:[%s127_s1] sm:$0xff]  ;;  %v61_v1 = vld [vmem:[%s127_s1 + $0x8] sm:$0xff] }
   0x2   :  { %93 = vlog2.f32 %v60_v0  ;;  %v62_v3 = vld [vmem:[%s128_s0] sm:$0xff]  ;;  %v63_v5 = vld [vmem:[%s128_s0 + $0x8] sm:$0xff] }
   0x3   :  { %95 = vlog2.f32 %v61_v1 }
   0xc   :  { %v94_v2 = vpop.eup %93 }
   0xd   :  { %v96_v4 = vpop.eup %95  ;;  %v65_v6 = vmul.f32 0.6931472, %v94_v2 }
   0xe   :  { %v67_v7 = vmul.f32 0.6931472, %v96_v4 }
   0xf   :  { %v68_v8 = vsub.f32 %v65_v6, %v62_v3 }
  0x10   :  { %v69_v9 = vsub.f32 %v67_v7, %v63_v5 }
  0x11   :  { %v70_v10 = vmul.f32 %v68_v8, %v68_v8 }
  0x12   :  { %v71_v11 = vmul.f32 %v69_v9, %v69_v9 }
  0x14   :  { %v72_v12 = vadd.f32 %v71_v11, %v70_v10 }
  0x16   :  { %75 = vst [vmem:[%s129_s2] sm:$0xff] %v72_v12 }

</bundles_post_ra>
